<compile_context>
chip_gen: v7x
topology: tpu7x:2x2x1
jax: 0.10.0
libtpu: 0.0.40
codegen_flags: <defaults>
</compile_context>

<pallas_src>
import math

import jax
import jax.numpy as jnp
from jax import lax
from jax.experimental import pallas as pl
from jax.experimental.pallas import tpu as pltpu


def _round_up(a, m):
    return ((a + m - 1) // m) * m


def _make_conv_kernel(K, pad, W):
    """Build the per-tile kernel body (K, pad, W are static Python ints)."""

    def kernel(w_ref, b_ref, col_ref, o_ref):
        # w_ref:   (K, Cout, K*Cin)  f32, resident (same block every step, tiny)
        # b_ref:   (Cout, 1)         f32, resident
        # col_ref: (1, K*Cin, TN)    row-tap slab for this (batch, lane-tile)
        # o_ref:   (1, Cout, TN)     lane-dense output tile (already final layout)
        tn = col_ref.shape[-1]
        col = col_ref[0].astype(jnp.float32)                        # (K*Cin, TN)
        # w-coordinate of every lane (tile boundaries are multiples of W).
        w_pos = lax.broadcasted_iota(jnp.int32, (1, tn), 1) % W

        acc = None
        for kw in range(K):                                         # unrolled, K static
            d = kw - pad
            if d == 0:
                tap = col
            else:
                # Shift the flattened (h, w) lane axis by d; wrapped / row-crossing
                # lanes are exactly the width zero-padding positions -> mask to 0.
                rolled = pltpu.roll(col, shift=(-d) % tn, axis=1)
                if d < 0:
                    valid = w_pos >= (-d)
                else:
                    valid = w_pos < (W - d)
                tap = jnp.where(valid, rolled, jnp.float32(0.0))
            contrib = jnp.dot(w_ref[kw], tap,
                              preferred_element_type=jnp.float32)   # (Cout, TN)
            acc = contrib if acc is None else acc + contrib

        o_ref[0] = (acc + b_ref[...].astype(jnp.float32)).astype(o_ref.dtype)

    return kernel


def conv2d_pallas(x_nchw, weight_oikk, bias_o, kernel, *, tile_n=1024,
                  col_dtype=jnp.bfloat16):
    """Same-padding, stride-1 2D conv == torch.nn.Conv2d(..., padding=kernel//2)."""
    B, Cin, H, W = x_nchw.shape
    Cout = weight_oikk.shape[0]
    K = kernel
    # torch's padding=K//2 only yields an HxW ("same") output for odd K.
    assert K % 2 == 1, "only odd kernel sizes supported (same-padding path)"
    assert W >= K, "width must be >= kernel size"
    pad = K // 2
    KC = K * Cin
    HW = H * W

    # Lane tile: multiple of 128 (vreg lanes) AND of W (so grid-tile boundaries land
    # on row boundaries -> the in-kernel kw roll/mask is exact), capped at per-image
    # H*W (rounded up).  Default target 1024 per perf review.
    lane_align = (128 * W) // math.gcd(128, W)        # lcm(128, W)
    tn = max(lane_align,
             min(_round_up(tile_n, lane_align), _round_up(HW, lane_align)))
    n_hw = pl.cdiv(HW, tn)
    HW_pad = n_hw * tn

    # ---- wrapper glue: only the K row-taps are materialized (Kx input bytes, bf16),
    # already in their final (B, K*Cin, H*W) layout.  kw taps are formed in-kernel. ----
    xc = x_nchw.astype(col_dtype)
    x_rp = jnp.pad(xc, ((0, 0), (0, 0), (pad, pad), (0, 0)))        # pad rows only
    taps = [x_rp[:, :, kh:kh + H, :] for kh in range(K)]            # each (B,Cin,H,W)
    col_h = jnp.stack(taps, axis=1).reshape(B, KC, HW)              # (B, K*Cin, H*W)
    if HW_pad != HW:
        col_h = jnp.pad(col_h, ((0, 0), (0, 0), (0, HW_pad - HW)))

    # weights: (Cout, Cin, kh, kw) -> (kw, Cout, kh, Cin) -> (K, Cout, K*Cin); f32.
    w3 = jnp.transpose(weight_oikk, (3, 0, 2, 1)).reshape(K, Cout, KC).astype(jnp.float32)
    b2 = bias_o.reshape(Cout, 1).astype(jnp.float32)

    out_dtype = x_nchw.dtype
    col_isz = jnp.dtype(col_dtype).itemsize
    out_isz = jnp.dtype(out_dtype).itemsize

    # Per-step VMEM footprint (double-buffered col/out tiles + resident weights);
    # 4x margin, floored at 16 MiB, capped at 64 MiB (v7x physical).
    per_step = (2 * KC * tn * col_isz + 2 * Cout * tn * out_isz
                + 2 * K * Cout * KC * 4 + 2 * Cout * 4)
    vmem_limit = int(min(64 << 20, max(16 << 20, 4 * per_step)))

    cost = pl.CostEstimate(
        flops=2 * B * HW * Cout * K * KC,
        transcendentals=0,
        bytes_accessed=int(col_h.size * col_isz + w3.size * 4 + b2.size * 4
                           + B * Cout * HW_pad * out_isz),
    )

    out_flat = pl.pallas_call(
        _make_conv_kernel(K, pad, W),
        out_shape=jax.ShapeDtypeStruct((B, Cout, HW_pad), out_dtype),
        grid_spec=pltpu.PrefetchScalarGridSpec(
            num_scalar_prefetch=0,
            grid=(B, n_hw),
            in_specs=[
                pl.BlockSpec((K, Cout, KC), lambda b, t: (0, 0, 0)),   # weights
                pl.BlockSpec((Cout, 1), lambda b, t: (0, 0)),          # bias
                pl.BlockSpec((1, KC, tn), lambda b, t: (b, 0, t)),     # row-tap slab
            ],
            out_specs=pl.BlockSpec((1, Cout, tn), lambda b, t: (b, 0, t)),
        ),
        compiler_params=pltpu.CompilerParams(
            dimension_semantics=("parallel", "parallel"),
            vmem_limit_bytes=vmem_limit,
        ),
        cost_estimate=cost,
    )(w3, b2, col_h)

    # TODO(synk): for very large Cin (when KC*tn no longer fits v7x's 64 MiB VMEM),
    # add a contraction grid axis over KC chunks with a VMEM f32 accumulator.
    return out_flat[:, :, :HW].reshape(B, Cout, H, W)     # free reshape, no transpose


def _reference_conv(x_nchw, weight_oikk, bias_o, kernel):
    pad = kernel // 2
    out = lax.conv_general_dilated(
        x_nchw, weight_oikk,
        window_strides=(1, 1),
        padding=((pad, pad), (pad, pad)),
        dimension_numbers=("NCHW", "OIHW", "NCHW"),
    )
    return out + bias_o.reshape(1, -1, 1, 1)


if __name__ == "__main__":
    # Module config: Conv2d(in_channels=4, out_channels=8, kernel=3, bias=True)
    B, Cin, H, W = 2, 4, 16, 16
    Cout, K = 8, 3

    key = jax.random.PRNGKey(0)
    k_x, k_w, k_b = jax.random.split(key, 3)

    x = jax.random.normal(k_x, (B, Cin, H, W), dtype=jnp.float32)
    # Deterministic param init (torch-like uniform fan-in scaling).
    fan_in = Cin * K * K
    bound = 1.0 / (fan_in ** 0.5)
    weight = jax.random.uniform(k_w, (Cout, Cin, K, K), jnp.float32, -bound, bound)
    bias = jax.random.uniform(k_b, (Cout,), jnp.float32, -bound, bound)

    ref = _reference_conv(x, weight, bias, K)

    # Exact-math path (f32 col stream): tight check of the kernel math itself.
    out_f32 = jax.block_until_ready(
        conv2d_pallas(x, weight, bias, K, col_dtype=jnp.float32))
    assert out_f32.shape == (B, Cout, H, W)
    assert jnp.allclose(out_f32, ref, atol=1e-4, rtol=1e-4), "f32 path mismatch"

    # Default fast path (bf16 col stream, f32 accumulation): halves the dominant HBM
    # stream per perf review; tolerance relaxed accordingly.
    out = jax.block_until_ready(conv2d_pallas(x, weight, bias, K))
    assert out.shape == (B, Cout, H, W)
    assert jnp.allclose(out, ref, atol=5e-2, rtol=5e-2), "bf16 path mismatch"

    # TODO(synk): up/down/bilinear/pooling branches of the module (ConvTranspose2d,
    # MaxPool2d, bilinear Upsample) are not implemented here; only the kernel>0 path is.
    print("KERNEL_OK")
</pallas_src>

<mosaic_0001>
module attributes {stable_mosaic.version = 11 : i64} {
  func.func @kernel(%arg0: i32, %arg1: i32, %arg2: memref<3x8x12xf32, #tpu.memory_space<vmem>>, %arg3: memref<8x1xf32, #tpu.memory_space<vmem>>, %arg4: memref<1x12x256xf32, #tpu.memory_space<vmem>>, %arg5: memref<1x8x256xf32, #tpu.memory_space<vmem>>) attributes {dimension_semantics = [#tpu.dimension_semantics<parallel>, #tpu.dimension_semantics<parallel>], iteration_bounds = array<i64: 2, 1>, scalar_prefetch = 0 : i64, scratch_operands = 0 : i64, tpu.core_type = #tpu.core_type<tc>, window_params = [{pipeline_mode = #tpu.pipeline_mode<synchronous>, transform_indices = @transform_0, window_bounds = array<i64: 3, 8, 12>}, {pipeline_mode = #tpu.pipeline_mode<synchronous>, transform_indices = @transform_1, window_bounds = array<i64: 8, 1>}, {transform_indices = @transform_2, window_bounds = array<i64: 1, 12, 256>}, {transform_indices = @transform_3, window_bounds = array<i64: 1, 8, 256>}]} {
    %c0 = arith.constant 0 : index
    %c0_0 = arith.constant 0 : index
    %c0_1 = arith.constant 0 : index
    %0 = vector.load %arg4[%c0, %c0_0, %c0_1] : memref<1x12x256xf32, #tpu.memory_space<vmem>>, vector<1x12x256xf32>
    %1 = vector.shape_cast %0 : vector<1x12x256xf32> to vector<12x256xf32>
    %2 = tpu.iota {dimensions = array<i32: 1>} : vector<1x256xi32>
    %c16_i32 = arith.constant 16 : i32
    %c0_i32 = arith.constant 0 : i32
    %3 = arith.cmpi eq, %c16_i32, %c0_i32 : i32
    %c1_i32 = arith.constant 1 : i32
    %4 = arith.select %3, %c1_i32, %c16_i32 : i32
    %5 = vector.broadcast %4 : i32 to vector<1x256xi32>
    %6 = arith.remsi %2, %5 : vector<1x256xi32>
    %c0_i32_2 = arith.constant 0 : i32
    %7 = vector.broadcast %c0_i32_2 : i32 to vector<1x256xi32>
    %8 = arith.cmpi ne, %6, %7 : vector<1x256xi32>
    %c0_i32_3 = arith.constant 0 : i32
    %9 = vector.broadcast %c0_i32_3 : i32 to vector<1x256xi32>
    %10 = arith.cmpi slt, %6, %9 : vector<1x256xi32>
    %c0_i32_4 = arith.constant 0 : i32
    %11 = arith.cmpi slt, %4, %c0_i32_4 : i32
    %12 = vector.broadcast %11 : i1 to vector<1x256xi1>
    %13 = vector.broadcast %12 : vector<1x256xi1> to vector<1x256xi1>
    %14 = arith.xori %10, %13 : vector<1x256xi1>
    %15 = arith.andi %14, %8 : vector<1x256xi1>
    %16 = vector.broadcast %4 : i32 to vector<1x256xi32>
    %17 = arith.addi %6, %16 : vector<1x256xi32>
    %18 = arith.select %15, %17, %6 : vector<1x256xi1>, vector<1x256xi32>
    %c1_i32_5 = arith.constant 1 : i32
    %19 = tpu.dynamic_rotate %1 by %c1_i32_5 dim 1 : vector<12x256xf32>, i32 -> vector<12x256xf32>
    %c1_i32_6 = arith.constant 1 : i32
    %20 = vector.broadcast %c1_i32_6 : i32 to vector<1x256xi32>
    %21 = arith.cmpi sge, %18, %20 : vector<1x256xi32>
    %cst = arith.constant 0.000000e+00 : f32
    %22 = vector.shape_cast %21 : vector<1x256xi1> to vector<1x256xi1>
    %23 = vector.broadcast %22 : vector<1x256xi1> to vector<12x256xi1>
    %24 = vector.broadcast %cst : f32 to vector<12x256xf32>
    %25 = arith.select %23, %19, %24 : vector<12x256xi1>, vector<12x256xf32>
    %c0_7 = arith.constant 0 : index
    %c0_8 = arith.constant 0 : index
    %c0_9 = arith.constant 0 : index
    %26 = vector.load %arg2[%c0_7, %c0_8, %c0_9] : memref<3x8x12xf32, #tpu.memory_space<vmem>>, vector<1x8x12xf32>
    %27 = vector.shape_cast %26 : vector<1x8x12xf32> to vector<8x12xf32>
    %cst_10 = arith.constant dense<0.000000e+00> : vector<8x256xf32>
    %28 = tpu.matmul %27, %25, %cst_10 {dimension_numbers = #tpu.dot_dimension_numbers<[1], [0], [0], [1], [0, 0, 1, 1], [], []>} : vector<8x12xf32>, vector<12x256xf32>, vector<8x256xf32> -> vector<8x256xf32>
    %c1 = arith.constant 1 : index
    %c0_11 = arith.constant 0 : index
    %c0_12 = arith.constant 0 : index
    %29 = vector.load %arg2[%c1, %c0_11, %c0_12] : memref<3x8x12xf32, #tpu.memory_space<vmem>>, vector<1x8x12xf32>
    %30 = vector.shape_cast %29 : vector<1x8x12xf32> to vector<8x12xf32>
    %cst_13 = arith.constant dense<0.000000e+00> : vector<8x256xf32>
    %31 = tpu.matmul %30, %1, %cst_13 {dimension_numbers = #tpu.dot_dimension_numbers<[1], [0], [0], [1], [0, 0, 1, 1], [], []>} : vector<8x12xf32>, vector<12x256xf32>, vector<8x256xf32> -> vector<8x256xf32>
    %32 = arith.addf %28, %31 : vector<8x256xf32>
    %c255_i32 = arith.constant 255 : i32
    %33 = tpu.dynamic_rotate %1 by %c255_i32 dim 1 : vector<12x256xf32>, i32 -> vector<12x256xf32>
    %c15_i32 = arith.constant 15 : i32
    %34 = vector.broadcast %c15_i32 : i32 to vector<1x256xi32>
    %35 = arith.cmpi slt, %18, %34 : vector<1x256xi32>
    %cst_14 = arith.constant 0.000000e+00 : f32
    %36 = vector.shape_cast %35 : vector<1x256xi1> to vector<1x256xi1>
    %37 = vector.broadcast %36 : vector<1x256xi1> to vector<12x256xi1>
    %38 = vector.broadcast %cst_14 : f32 to vector<12x256xf32>
    %39 = arith.select %37, %33, %38 : vector<12x256xi1>, vector<12x256xf32>
    %c2 = arith.constant 2 : index
    %c0_15 = arith.constant 0 : index
    %c0_16 = arith.constant 0 : index
    %40 = vector.load %arg2[%c2, %c0_15, %c0_16] : memref<3x8x12xf32, #tpu.memory_space<vmem>>, vector<1x8x12xf32>
    %41 = vector.shape_cast %40 : vector<1x8x12xf32> to vector<8x12xf32>
    %cst_17 = arith.constant dense<0.000000e+00> : vector<8x256xf32>
    %42 = tpu.matmul %41, %39, %cst_17 {dimension_numbers = #tpu.dot_dimension_numbers<[1], [0], [0], [1], [0, 0, 1, 1], [], []>} : vector<8x12xf32>, vector<12x256xf32>, vector<8x256xf32> -> vector<8x256xf32>
    %43 = arith.addf %32, %42 : vector<8x256xf32>
    %c0_18 = arith.constant 0 : index
    %c0_19 = arith.constant 0 : index
    %44 = vector.load %arg3[%c0_18, %c0_19] : memref<8x1xf32, #tpu.memory_space<vmem>>, vector<8x1xf32>
    %45 = vector.broadcast %44 : vector<8x1xf32> to vector<8x256xf32>
    %46 = arith.addf %43, %45 : vector<8x256xf32>
    %c0_20 = arith.constant 0 : index
    %c0_21 = arith.constant 0 : index
    %c0_22 = arith.constant 0 : index
    %47 = vector.load %arg5[%c0_20, %c0_21, %c0_22] : memref<1x8x256xf32, #tpu.memory_space<vmem>>, vector<1x8x256xf32>
    %48 = vector.shape_cast %47 : vector<1x8x256xf32> to vector<8x256xf32>
    %49 = vector.shape_cast %46 : vector<8x256xf32> to vector<1x8x256xf32>
    tpu.vector_store %arg5[%c0_20, %c0_21, %c0_22], %49 {strides = array<i32>} : memref<1x8x256xf32, #tpu.memory_space<vmem>>, vector<1x8x256xf32>,
    return
  }
  func.func @transform_0(%arg0: i32, %arg1: i32) -> (i32, i32, i32) {
    %c0_i32 = arith.constant 0 : i32
    %c0_i32_0 = arith.constant 0 : i32
    %c0_i32_1 = arith.constant 0 : i32
    %c0_i32_2 = arith.constant 0 : i32
    return %c0_i32, %c0_i32_0, %c0_i32_1 : i32, i32, i32
  }
  func.func @transform_1(%arg0: i32, %arg1: i32) -> (i32, i32) {
    %c0_i32 = arith.constant 0 : i32
    %c0_i32_0 = arith.constant 0 : i32
    %c0_i32_1 = arith.constant 0 : i32
    return %c0_i32, %c0_i32_0 : i32, i32
  }
  func.func @transform_2(%arg0: i32, %arg1: i32) -> (i32, i32, i32) {
    %c0_i32 = arith.constant 0 : i32
    %c0_i32_0 = arith.constant 0 : i32
    return %arg0, %c0_i32, %arg1 : i32, i32, i32
  }
  func.func @transform_3(%arg0: i32, %arg1: i32) -> (i32, i32, i32) {
    %c0_i32 = arith.constant 0 : i32
    %c0_i32_0 = arith.constant 0 : i32
    return %arg0, %c0_i32, %arg1 : i32, i32, i32
  }
}

</mosaic_0001>

<bundles_post_ra>
// kernel: tpu_custom_call.1
= control target key start
LH: loop header
LB: loop body
LE: loop exit
PB: predicated region body
PF: predicated region fallthrough
CT: control target
= control target key end

     0   :  { %8 = vsyncpa [#allocation3], 0  ;;  %s1043_s0 = inlined_call_operand.vmem [shape: f32[3,8,12], index: 0, kind: input, shape index: {}]   ;;  %s1044_s1 = inlined_call_operand.vmem [shape: f32[8,1], index: 1, kind: input, shape index: {}]   ;;  %s1045_s2 = inlined_call_operand.vmem [shape: f32[2,12,256], index: 2, kind: input, shape index: {}]   ;;  %s1046_s3 = inlined_call_operand.hbm [shape: f32[2,8,256], index: 3, kind: output, shape index: {}]  }
   0x1   :  { %10 = vsyncpa [#allocation3 + $0x1], 0  ;;  %s868_s12 = smov 0   ;;  %s870_s13 = smov 0  }
   0x2   :  { %s872_s14 = smov 0   ;;  %s874_s15 = smov 0  }
   0x3   :  { %s876_s16 = smov 0   ;;  %s878_s17 = smov 0  }
   0x4 LB: > { %s629_s18 = sadd.s32 4294967295, %s840_s17   ;;  %s630_s19 = sadd.s32 4294967294, %s840_s17   ;;  %s840_s17 = sphi %s878_s17, %s16_s17   ;;  %s836_s16 = sphi %s876_s16, %s1061_s16   ;;  %s832_s15 = sphi %s874_s15, %s1060_s15   ;;  %s828_s14 = sphi %s872_s14, %s1059_s14   ;;  %s824_s13 = sphi %s870_s13, %s1058_s13   ;;  %s820_s12 = sphi %s868_s12, %s1057_s12  }
   0x5   : > { %s28_s20 = sadd.s32 1, %s836_s16  ;;  %s107_s21 = sadd.s32 1, %s828_s14 }
   0x6   : > { %p30_p0 = scmp.ge.s32.totalorder %s28_s20, 2  ;;  %p117_p1 = scmp.ne.s32.totalorder %s828_s14, %s824_s13 }
   0x7   : > { %p118_p2 = scmp.eq.s32.totalorder %s629_s18, 1  ;;  %p123_p3 = scmp.ne.s32.totalorder %s824_s13, %s820_s12 }
   0x8   : > { %s1063_s20 = smov (%p30_p0, %s28_s20), 0  ;;  %p124_p5 = scmp.eq.s32.totalorder %s630_s19, 1 }
   0x9   : > { %p908_p4 = por %p118_p2, %p117_p1  ;;  %s102_s23 = ssub.s32 %s836_s16, %s1063_s20 }
   0xa   : > { %p633_p6 = scmp.ge.s32.totalorder %s840_s17, 1  ;;  %p105_p7 = scmp.eq.s32.totalorder %s102_s23, 0 }
   0xb   : > { %p915_p8 = por %p124_p5, %p123_p3  ;;  %p161_p9 = scmp.lt.s32.totalorder %s840_s17, 3 }
   0xc   : > { %s921_s25 = scalar_select %p105_p7, %s828_s14, %s107_s21  }
   0xd   : > { %p162_p10 = pnand %p633_p6, %p161_p9 }
   0xe   : > { %p190_p11 = scmp.lt.s32.totalorder (!%p162_p10), %s832_s15, 1  ;;  %s842_s4 = smov (!%p162_p10), 1   ;;  %v844_v6 = vmov (!%p162_p10), 0.0   ;;  %vm261_vm0 = vcmask (!%p162_p10), 1043456   ;;  %vm845_vm1 = vmmov (!%p162_p10), 1   ;;  %v637_v9 = vld [vmem:[%s1043_s0 + $0x8] sm:$0xff] (!%p162_p10)  ;;  %v204_v12 = vlaneseq (!%p162_p10) }
   0xf   : > { %165 = sbr.rel (%p162_p10) target bundleno = 396 (0x18c), region = 32  ;;  %s843_s5 = smov (!%p162_p10), 127   ;;  %412 = vmatprep.mubr.f32.mxu0 (!%p162_p10), %v844_v6  ;;  %332 = vmatprep.mubr.f32.mxu1 (!%p162_p10), %v844_v6  ;;  %vm660_vm2 = vmpackc.low (!%p162_p10), %vm261_vm0, %vm845_vm1  ;;  %vm257_vm3 = vcmask (!%p162_p10), 97280   ;;  %v526_v10 = vld [vmem:[%s1044_s1] sm:$0xff] (!%p162_p10)  ;;  %v846_v11 = vmov (!%p162_p10), 0   ;;  %v646_v50 = vld [vmem:[%s1043_s0 + $0x10] sm:$0xff] (!%p162_p10) }
  0x10   : > { %761 = vset.pattern.permute.xlu0 (!%p162_p10), %v846_v11  ;;  %v205_v13 = vand.u32 (!%p162_p10), 127, %v204_v12  ;;  %v254_v49 = vld [vmem:[%s1043_s0] sm:$0xff] (!%p162_p10)  ;;  %s186_s21 = sand.u32 (!%p162_p10), 1, %s824_s13  }
  0x11   : > { %s634_s23 = sshll.u32 (!%p162_p10), %s186_s21, 4 }
  0x12   : > { %v206_v14 = vadd.s32 (!%p162_p10), 128, %v205_v13  ;;  %v211_v16 = vand.u32 (!%p162_p10), 15, %v205_v13  ;;  %vm427_vm4 = vcmp.lt.s32.totalorder (!%p162_p10), %v205_v13, 127  ;;  %vm239_vm5 = vcmp.lt.s32.totalorder (!%p162_p10), %v205_v13, 1 }
  0x14   : > { %v218_v15 = vand.u32 (!%p162_p10), 15, %v206_v14  ;;  %vm942_vm7 = vcmp.ge.s32.totalorder (!%p162_p10), %v211_v16, 1  ;;  %vm954_vm9 = vcmp.lt.s32.totalorder (!%p162_p10), %v211_v16, 15 }
  0x15   : > { %vm669_vm11 = vmpackc.low (!%p162_p10), %vm261_vm0, %vm942_vm7 }
  0x16   : > { %s191_s26 = scalar_select %p190_p11, %s832_s15, 1  ;;  %vm938_vm6 = vcmp.lt.s32.totalorder %v218_v15, 15  ;;  %vm948_vm8 = vcmp.ge.s32.totalorder %v218_v15, 1  ;;  %vm675_vm13 = vmpackc.low %vm261_vm0, %vm954_vm9 }
  0x17   : > { %vm666_vm10 = vmpackc.low %vm261_vm0, %vm948_vm8 }
  0x18   : > { %s657_s27 = sshll.u32 %s191_s26, 5  ;;  %vm672_vm12 = vmpackc.low %vm261_vm0, %vm938_vm6  ;;  %s658_s26 = sshll.u32 %s832_s15, 8 }
  0x19   : > { %s197_s30 = scalar_lea.vmem %s1045_s2, %s657_s27  ;;  %s188_s27 = scalar_lea.vmem [#allocation2], %s634_s23 }
  0x1a   : > { %v202_v0 = vld [vmem:[%s197_s30 + $0x10] sm:$0xf]  ;;  %v203_v1 = vld [vmem:[%s197_s30 + $0x18] sm:$0xf]  ;;  %v200_v2 = vld [vmem:[%s197_s30] sm:$0xff]  ;;  %s553_s28 = sshll.u32 %s188_s27, 4  ;;  %s998_s28 = int_to_ptr.vmem [resolvable:$true] %s553_s28 }
  0x1b   : > { %v741_v3 = vpack.i.bf16 %v203_v1, %v202_v0  ;;  %v201_v4 = vld [vmem:[%s197_s30 + $0x8] sm:$0xff]  ;;  %v662_v8 = vpack.c.bf16 %v202_v0, %v200_v2  ;;  %s762_s6 = scalar_lea.vmem %s998_s28, 256  ;;  %s847_s15 = smov [#allocation2]  }
  0x1c   : > { %v746_v5 = vpack.i.bf16 %v201_v4, %v200_v2  ;;  %v659_v7 = vpack.c.bf16 %v203_v1, %v201_v4  ;;  %p763_p12 = scmp.ne.s32.totalorder %s998_s28, %s762_s6  ;;  %s766_s7 = sshll.u32 %s847_s15, 4  ;;  %s767_s7 = int_to_ptr.vmem [resolvable:$false] %s766_s7 }
  0x1d   : > { %742 = vrot.lane.b32.xlu0 %v741_v3, %s842_s4  ;;  %752 = vrot.lane.b32.xlu1 %v741_v3, %s843_s5  ;;  %s768_s8 = scalar_lea.vmem %s767_s7, 512  ;;  %p769_p1 = scmp.lt.s32.totalorder %s998_s28, %s767_s7 }
  0x1e   : > { %661 = vmatprep.subr.msk.bf16.mxu1 %vm660_vm2, %v659_v7  ;;  %p764_p13 = pnand %p763_p12, %p908_p4  ;;  %p770_p2 = scmp.lt.s32.totalorder %s768_s8, %s762_s6 }
  0x1f   : > { %664 = vmatpush1.bf16.msk.msra.mxu1 %vm660_vm2, %v662_v8 }
  0x20   : > { %p765_p0 = pneg %p764_p13  ;;  %p771_p3 = por %p770_p2, %p769_p1 }
  0x21   : > { %747 = vrot.lane.b32.xlu0 %v746_v5, %s842_s4  ;;  %757 = vrot.lane.b32.xlu1 %v746_v5, %s843_s5  ;;  %s996_s4 = scalar_lea.hbm %s1046_s3, %s658_s26  ;;  %s537_s5 = scalar_lea.sflag [#allocation3], %s186_s21 }
  0x22   : > { %640 = vmatmul.mubr.msk.f32.vlgmr.msra.gmra.mrb[0].mxu1 %vm257_vm3, %v637_v9  ;;  %p772_p5 = pnand %p771_p3, %p765_p0 }
  0x25   : > { %529 = vperm.xlu0 %761, %v526_v10  }
  0x8f   : > { %v743_v17 = vpop.permute.xlu0 %742  ;;  %v753_v18 = vpop.permute.xlu1 %752 }
  0x90   : > { %v745_v20 = vunpack.i.h.bf16 %v743_v17  ;;  %v744_v21 = vunpack.i.l.bf16 %v743_v17  ;;  %v755_v22 = vunpack.i.h.bf16 %v753_v18  ;;  %v754_v23 = vunpack.i.l.bf16 %v753_v18 }
  0x92   : > { %v431_v25 = vsel %vm427_vm4, %v755_v22, %v754_v23  ;;  %v241_v26 = vsel %vm239_vm5, %v744_v21, %v745_v20  ;;  %v243_v28 = vsel %vm239_vm5, %v745_v20, %v744_v21  ;;  %v429_v29 = vsel %vm427_vm4, %v754_v23, %v755_v22 }
  0x93   : > { %v748_v30 = vpop.permute.xlu0 %747  ;;  %v758_v31 = vpop.permute.xlu1 %757  ;;  %v441_v33 = vsel %vm938_vm6, %v431_v25, 0.0  ;;  %v253_v38 = vsel %vm948_vm8, %v241_v26, 0.0  ;;  %v252_v39 = vsel %vm942_vm7, %v243_v28, 0.0  ;;  %v440_v43 = vsel %vm954_vm9, %v429_v29, 0.0 }
  0x94   : > { %v750_v34 = vunpack.i.h.bf16 %v748_v30  ;;  %v749_v35 = vunpack.i.l.bf16 %v748_v30  ;;  %v760_v36 = vunpack.i.h.bf16 %v758_v31  ;;  %v759_v37 = vunpack.i.l.bf16 %v758_v31 }
  0x96   : > { %v430_v40 = vsel %vm427_vm4, %v760_v36, %v759_v37  ;;  %v240_v41 = vsel %vm239_vm5, %v749_v35, %v750_v34  ;;  %v242_v42 = vsel %vm239_vm5, %v750_v34, %v749_v35  ;;  %v428_v44 = vsel %vm427_vm4, %v759_v37, %v760_v36 }
  0x97   : > { %v665_v45 = vpack.c.bf16 %v253_v38, %v240_v41  ;;  %v668_v46 = vpack.c.bf16 %v252_v39, %v242_v42  ;;  %v671_v47 = vpack.c.bf16 %v441_v33, %v430_v40  ;;  %v674_v48 = vpack.c.bf16 %v440_v43, %v428_v44 }
  0x99   : > { %667 = vmatprep.subr.msk.bf16.mxu0 %vm666_vm10, %v665_v45 }
  0x9a   : > { %670 = vmatpush1.bf16.msk.msra.mxu0 %vm669_vm11, %v668_v46 }
  0x9b   : > { %673 = vmatprep.subr.msk.bf16.mxu0 %vm672_vm12, %v671_v47 }
  0x9d   : > { %645 = vmatmul.mubr.msk.f32.vlgmr.msra.gmra.mrb[0].mxu0 %vm257_vm3, %v254_v49 }
  0x9e   : > { %676 = vmatpush1.bf16.msk.msra.mxu0 %vm675_vm13, %v674_v48  ;;  %517 = vmatprep.mubr.f32.mxu0 %v844_v6 }
  0xa4   : > { %v530_v54 = vpop.permute.xlu0 %529 }
  0xa5   : > { %651 = vmatmul.mubr.msk.f32.vlgmr.msra.gmra.mrb[0].mxu0 %vm257_vm3, %v646_v50 }
  0xf5   : > { %v334_v51 = vpop.f32.mrb[0].mxu1 }
  0xf6   : > { %v336_v52 = vpop.f32.mrb[1].mxu1 }
 0x178   : > { %v519_v53 = vpop.f32.mrb[0].mxu0 }
 0x179   : > { %v677_v55 = vadd.f32 %v519_v53, %v334_v51  ;;  %v521_v56 = vpop.f32.mrb[1].mxu0 }
 0x17a   : > { %v678_v57 = vadd.f32 %v521_v56, %v336_v52 }
 0x17b   : > { %v532_v58 = vadd.f32 %v677_v55, %v530_v54 }
 0x17c   : > { %v533_v59 = vadd.f32 %v678_v57, %v530_v54 }
 0x17d   : > { %534 = vst [vmem:[%s188_s27] sm:$0xff] %v532_v58 }
 0x17e   : > { %535 = vst [vmem:[%s188_s27 + $0x8] sm:$0xff] %v533_v59 }
 0x17f   : > { %775 = shalt.err (!%p772_p5)
}
 0x180   : > { %s776_s9 = scalar_lea.hbm %s996_s4, 256  ;;  %s780_s18 = scalar_lea.hbm %s1046_s3, 512 }
 0x181   : > { %p777_p6 = scmp.ne.s32.totalorder %s996_s4, %s776_s9  ;;  %p781_p10 = scmp.lt.u32.totalorder %s996_s4, %s1046_s3 }
 0x182   : > { %p782_p11 = scmp.lt.u32.totalorder %s780_s18, %s776_s9  ;;  %p784_p13 = scmp.lt.u32.totalorder %s776_s9, %s996_s4 }
 0x183   : > { %p778_p7 = pnand %p777_p6, %p908_p4 }
 0x184   : > { %p783_p12 = por %p782_p11, %p781_p10 }
 0x185   : > { %p779_p9 = pneg %p778_p7 }
 0x186   : > { %p785_p0 = por %p784_p13, %p783_p12 }
 0x188   : > { %p786_p1 = pnand %p785_p0, %p779_p9 }
 0x18a   : > { %789 = shalt.err (!%p786_p1)
}
 0x18b   : > { %681 = dma.vmem_to_hbm [thread:$0]  (%p908_p4), %s998_s28, 256, %s996_s4, %s537_s5  }
 0x18c PF: > { %p687_p2 = scmp.ge.s32.totalorder %s840_s17, 2  ;;  %s565_s23 = sand.u32 1, %s820_s12  }
 0x18d   : > { %s566_s26 = scalar_lea.sflag [#allocation3], %s565_s23 }
 0x18e   : > { %p684_p3 = pnand %p687_p2, %p915_p8 }
 0x190   : > { %815 = dma.done.wait (!%p684_p3), %s566_s26, 256  }
 0x191   : > { %817 = vsyncadd (!%p684_p3), %s566_s26, 4294967040  ;;  %s16_s17 = sadd.s32 1, %s840_s17   ;;  %s1057_s12 = smov %s824_s13 }
 0x192   : > { %p13_p5 = scmp.ge.s32.totalorder %s16_s17, 4   ;;  %s1058_s13 = smov %s828_s14 }
 0x193   : > { %s1059_s14 = smov %s921_s25  ;;  %s1060_s15 = smov %s836_s16 }
 0x194   : > { %s1061_s16 = smov %s1063_s20  ;;  %15 = sbr.rel (!%p13_p5) target bundleno = 4 (0x4), region = 69 }
 0x19b   :  { %571 = vsyncpa [#allocation3], 1 }
 0x19c   :  { %573 = vsyncpa [#allocation3 + $0x1], 1 }

</bundles_post_ra>
